<compile_context>
chip_gen: v6e
topology: v6e:2x2x1
jax: 0.10.0
libtpu: 0.0.40
codegen_flags: <defaults>
</compile_context>

<pallas_src>
import jax
import jax.numpy as jnp
from jax.experimental import pallas as pl
from jax.experimental.pallas import tpu as pltpu


MATMUL_DTYPE = jnp.bfloat16  # MXU-native on v5e/v6e/v7x; accumulation stays f32.


def _round_up(x, m):
    return ((x + m - 1) // m) * m


def _rnn_seq_kernel(x_ref, wih_ref, whh_ref, b_ref, wfc_ref, bfc_ref,
                    logits_ref, hid_ref, xw_ref):
    """Whole-sequence tanh-RNN recurrence + fused fc, single invocation.

    x_ref:   (S*Bp, Ep)  bf16  embedded sequence, time-major, flattened
    wih_ref: (Ep, Hp)    bf16  W_ih^T (padded)
    whh_ref: (Hp, Hp)    bf16  W_hh^T (padded)
    b_ref:   (1, Hp)     f32   b_ih + b_hh (padded)
    wfc_ref: (Hp, Op)    bf16  W_fc^T (padded)
    bfc_ref: (1, Op)     f32   b_fc (padded)
    logits_ref: (Bp, Op) f32
    hid_ref:    (Bp, Hp) f32
    xw_ref:  (S*Bp, Hp)  f32 scratch: precomputed input projection + bias
    """
    SB = x_ref.shape[0]
    Bp, Hp = hid_ref.shape
    S = SB // Bp

    # (1) Hoisted input projection: ONE large MXU matmul over all timesteps
    #     at M = S*Bp (near-full MXU occupancy) with the bias folded in, so
    #     the serial critical path sees neither this matmul nor the bias add.
    xw_ref[...] = (
        jnp.dot(x_ref[...], wih_ref[...], preferred_element_type=jnp.float32)
        + jnp.broadcast_to(b_ref[...], (SB, Hp))
    )

    # (2) Serial recurrence: per step only h @ W_hh (bf16 operands, f32
    #     accumulation), one VPU add and one EUP tanh. h is carried in f32
    #     loop-value vregs (no per-step VMEM store/load of h).
    whh = whh_ref[...]  # loop-invariant load, hoisted

    def step(t, h):
        start = pl.multiple_of(t * Bp, Bp)          # sublane-aligned slice
        xw_t = xw_ref[pl.ds(start, Bp), :]
        hw = jnp.dot(h.astype(whh.dtype), whh,
                     preferred_element_type=jnp.float32)
        return jnp.tanh(xw_t + hw)

    h0 = jnp.zeros((Bp, Hp), jnp.float32)
    # Fixed small unroll: enough LLO overlap for the reduced body without
    # blowing up live vregs / code size when S or Hp grow.
    h = jax.lax.fori_loop(0, S, step, h0, unroll=min(8, S))
    # TODO(synk): for production sizes, drive the MXU explicitly here
    # (matmul_push_rhs(W_hh) once, matmul_acc_lhs per step) to avoid the
    # per-step weight re-push, especially on v7x's MRB.

    # (3) Fused output head.
    hid_ref[...] = h
    logits_ref[...] = (
        jnp.dot(h.astype(wfc_ref.dtype), wfc_ref[...],
                preferred_element_type=jnp.float32)
        + jnp.broadcast_to(bfc_ref[...], logits_ref.shape)
    )


def prepare_rnn_params(params, matmul_dtype=MATMUL_DTYPE):
    """One-time padding / transposition of weights to hardware-native tiles.

    Done at init (NOT per forward call): the embedding table is padded to a
    lane-multiple Ep so the gather already produces lane-dense activations,
    and the weight slabs are pre-transposed/padded/cast once.
    """
    vocab, E = params["embedding"].shape
    H = params["w_hh"].shape[0]
    O = params["w_fc"].shape[0]
    Ep, Hp, Op = _round_up(E, 128), _round_up(H, 128), _round_up(O, 128)

    f32 = jnp.float32
    emb = jnp.zeros((vocab, Ep), matmul_dtype).at[:, :E].set(
        params["embedding"].astype(matmul_dtype))
    wih = jnp.zeros((Ep, Hp), matmul_dtype).at[:E, :H].set(
        params["w_ih"].T.astype(matmul_dtype))
    whh = jnp.zeros((Hp, Hp), matmul_dtype).at[:H, :H].set(
        params["w_hh"].T.astype(matmul_dtype))
    b = jnp.zeros((1, Hp), f32).at[:, :H].set(
        (params["b_ih"] + params["b_hh"]).astype(f32).reshape(1, -1))
    wfc = jnp.zeros((Hp, Op), matmul_dtype).at[:H, :O].set(
        params["w_fc"].T.astype(matmul_dtype))
    bfc = jnp.zeros((1, Op), f32).at[:, :O].set(
        params["b_fc"].astype(f32).reshape(1, -1))
    return {
        "embedding": emb, "w_ih_t": wih, "w_hh_t": whh, "b": b,
        "w_fc_t": wfc, "b_fc": bfc,
        "dims": {"E": E, "H": H, "O": O, "Ep": Ep, "Hp": Hp, "Op": Op},
    }


def rnn_forward_pallas(x2d, wih, whh, b, wfc, bfc, *, S, Bp, Hp, Op):
    """x2d: [S*Bp, Ep] bf16 (padded). Returns (logits [Bp,Op] f32, hid [Bp,Hp] f32)."""
    SB, Ep = x2d.shape

    xw_bytes = SB * Hp * 4
    in_bytes = (x2d.size * x2d.dtype.itemsize
                + wih.size * wih.dtype.itemsize
                + whh.size * whh.dtype.itemsize
                + wfc.size * wfc.dtype.itemsize
                + b.size * 4 + bfc.size * 4)
    out_bytes = (Bp * Op + Bp * Hp) * 4
    vmem_needed = in_bytes + out_bytes + xw_bytes
    vmem_limit = int(min(max(2 * vmem_needed, 8 << 20), 100 << 20))

    cost = pl.CostEstimate(
        flops=2 * SB * Ep * Hp + 2 * SB * Hp * Hp + 2 * Bp * Hp * Op,
        transcendentals=SB * Hp,
        bytes_accessed=in_bytes + out_bytes + 2 * xw_bytes,
    )

    vmem_spec = pl.BlockSpec(memory_space=pltpu.MemorySpace.VMEM)
    logits_p, hid_p = pl.pallas_call(
        _rnn_seq_kernel,
        out_shape=(
            jax.ShapeDtypeStruct((Bp, Op), jnp.float32),
            jax.ShapeDtypeStruct((Bp, Hp), jnp.float32),
        ),
        in_specs=[vmem_spec] * 6,
        out_specs=(vmem_spec, vmem_spec),
        scratch_shapes=[pltpu.VMEM((SB, Hp), jnp.float32)],
        compiler_params=pltpu.CompilerParams(vmem_limit_bytes=vmem_limit),
        cost_estimate=cost,
    )(x2d, wih, whh, b, wfc, bfc)
    # TODO(synk): for production-scale S, chunk the time axis (grid over time
    # chunks with h in a persistent VMEM scratch, or manual double-buffered
    # make_async_copy of xw chunks) so the slab fits v7x's 64 MiB VMEM; when
    # Bp >= 16 on v7x, also shard batch rows across the two TensorCores via a
    # leading "parallel" grid axis.
    return logits_p, hid_p


def rnn_module_forward(text, prep):
    """Full module forward. text: int32 [seq_len, batch].

    Returns (logits [B, O], hidden [1, B, H]) matching the PyTorch module.
    """
    S, B = text.shape
    d = prep["dims"]
    Bp = _round_up(max(B, 8), 8)

    # Pad batch by padding token ids (index 0 is valid; padded rows are
    # computed and sliced away) - no extra HBM copy of the activation slab.
    text_p = jnp.zeros((S, Bp), text.dtype).at[:, :B].set(text)

    # Embedding lookup (gather) stays in plain-JAX glue around the kernel;
    # the table is already lane-padded and bf16, so the gather output is the
    # kernel's input layout directly.
    embedded = jnp.take(prep["embedding"], text_p, axis=0)   # (S, Bp, Ep)
    x2d = embedded.reshape(S * Bp, d["Ep"])

    logits_p, hid_p = rnn_forward_pallas(
        x2d, prep["w_ih_t"], prep["w_hh_t"], prep["b"],
        prep["w_fc_t"], prep["b_fc"],
        S=S, Bp=Bp, Hp=d["Hp"], Op=d["Op"])

    logits = logits_p[:B, :d["O"]]
    hidden = hid_p[:B, :d["H"]][None, :, :]   # [1, B, H]
    return logits, hidden


def rnn_module_reference(text, params):
    """Pure-JAX f32 reference for validation."""
    embedded = jnp.take(params["embedding"], text, axis=0)
    S, B, _ = embedded.shape
    H = params["w_hh"].shape[0]
    h = jnp.zeros((B, H), jnp.float32)
    for t in range(S):
        h = jnp.tanh(embedded[t] @ params["w_ih"].T + params["b_ih"]
                     + h @ params["w_hh"].T + params["b_hh"])
    logits = h @ params["w_fc"].T + params["b_fc"]
    return logits, h[None]


if __name__ == "__main__":
    # small deterministic config
    input_dim = 16        # vocab size
    embedding_dim = 32
    hidden_dim = 32
    output_dim = 8
    seq_len = 8
    batch = 4

    key = jax.random.PRNGKey(0)
    keys = jax.random.split(key, 8)
    bound = 1.0 / jnp.sqrt(hidden_dim)

    params = {
        "embedding": jax.random.normal(keys[0], (input_dim, embedding_dim), jnp.float32),
        "w_ih": jax.random.uniform(keys[1], (hidden_dim, embedding_dim), jnp.float32, -bound, bound),
        "w_hh": jax.random.uniform(keys[2], (hidden_dim, hidden_dim), jnp.float32, -bound, bound),
        "b_ih": jax.random.uniform(keys[3], (hidden_dim,), jnp.float32, -bound, bound),
        "b_hh": jax.random.uniform(keys[4], (hidden_dim,), jnp.float32, -bound, bound),
        "w_fc": jax.random.uniform(keys[5], (output_dim, hidden_dim), jnp.float32, -bound, bound),
        "b_fc": jax.random.uniform(keys[6], (output_dim,), jnp.float32, -bound, bound),
    }

    text = jax.random.randint(keys[7], (seq_len, batch), 0, input_dim, dtype=jnp.int32)

    prep = prepare_rnn_params(params)          # one-time weight padding/cast
    logits, hidden = rnn_module_forward(text, prep)
    logits = jax.block_until_ready(logits)
    hidden = jax.block_until_ready(hidden)

    # sanity-check against pure-JAX f32 reference (bf16 MXU operands with f32
    # accumulation -> relaxed tolerance).
    ref_logits, ref_hidden = rnn_module_reference(text, params)
    assert logits.shape == (batch, output_dim)
    assert hidden.shape == (1, batch, hidden_dim)
    assert jnp.allclose(logits, ref_logits, atol=3e-2), \
        float(jnp.max(jnp.abs(logits - ref_logits)))
    assert jnp.allclose(hidden, ref_hidden, atol=3e-2), \
        float(jnp.max(jnp.abs(hidden - ref_hidden)))

    print("KERNEL_OK")
</pallas_src>

<mosaic_0001>
module attributes {stable_mosaic.version = 11 : i64} {
  func.func @_rnn_seq_kernel(%arg0: memref<64x128xbf16, #tpu.memory_space<vmem>>, %arg1: memref<128x128xbf16, #tpu.memory_space<vmem>>, %arg2: memref<128x128xbf16, #tpu.memory_space<vmem>>, %arg3: memref<1x128xf32, #tpu.memory_space<vmem>>, %arg4: memref<128x128xbf16, #tpu.memory_space<vmem>>, %arg5: memref<1x128xf32, #tpu.memory_space<vmem>>, %arg6: memref<8x128xf32, #tpu.memory_space<vmem>>, %arg7: memref<8x128xf32, #tpu.memory_space<vmem>>, %arg8: memref<64x128xf32, #tpu.memory_space<vmem>>) attributes {dimension_semantics = [], scalar_prefetch = 0 : i64, scratch_operands = 1 : i64, tpu.core_type = #tpu.core_type<tc>} {
    %c0 = arith.constant 0 : index
    %c0_0 = arith.constant 0 : index
    %0 = vector.load %arg0[%c0, %c0_0] : memref<64x128xbf16, #tpu.memory_space<vmem>>, vector<64x128xbf16>
    %c0_1 = arith.constant 0 : index
    %c0_2 = arith.constant 0 : index
    %1 = vector.load %arg1[%c0_1, %c0_2] : memref<128x128xbf16, #tpu.memory_space<vmem>>, vector<128x128xbf16>
    %cst = arith.constant dense<0.000000e+00> : vector<64x128xf32>
    %2 = tpu.matmul %0, %1, %cst {dimension_numbers = #tpu.dot_dimension_numbers<[1], [0], [0], [1], [0, 0, 1, 1], [], []>} : vector<64x128xbf16>, vector<128x128xbf16>, vector<64x128xf32> -> vector<64x128xf32>
    %c0_3 = arith.constant 0 : index
    %c0_4 = arith.constant 0 : index
    %3 = vector.load %arg3[%c0_3, %c0_4] : memref<1x128xf32, #tpu.memory_space<vmem>>, vector<1x128xf32>
    %4 = vector.shape_cast %3 : vector<1x128xf32> to vector<1x128xf32>
    %5 = vector.broadcast %4 : vector<1x128xf32> to vector<64x128xf32>
    %6 = arith.addf %2, %5 : vector<64x128xf32>
    %c0_5 = arith.constant 0 : index
    %c0_6 = arith.constant 0 : index
    %7 = vector.load %arg8[%c0_5, %c0_6] : memref<64x128xf32, #tpu.memory_space<vmem>>, vector<64x128xf32>
    tpu.vector_store %arg8[%c0_5, %c0_6], %6 {strides = array<i32>} : memref<64x128xf32, #tpu.memory_space<vmem>>, vector<64x128xf32>,
    %c0_7 = arith.constant 0 : index
    %c0_8 = arith.constant 0 : index
    %8 = vector.load %arg2[%c0_7, %c0_8] : memref<128x128xbf16, #tpu.memory_space<vmem>>, vector<128x128xbf16>
    %cst_9 = arith.constant 0.000000e+00 : f32
    %9 = vector.broadcast %cst_9 : f32 to vector<8x128xf32>
    %c0_i32 = arith.constant 0 : i32
    %c8_i32 = arith.constant 8 : i32
    %10 = arith.muli %c0_i32, %c8_i32 : i32
    %11 = tpu.assume_multiple %10, 8 : i32
    %12 = arith.index_cast %11 : i32 to index
    %c0_10 = arith.constant 0 : index
    %13 = vector.load %arg8[%12, %c0_10] : memref<64x128xf32, #tpu.memory_space<vmem>>, vector<8x128xf32>
    %14 = arith.truncf %9 : vector<8x128xf32> to vector<8x128xbf16>
    %cst_11 = arith.constant dense<0.000000e+00> : vector<8x128xf32>
    %15 = tpu.matmul %14, %8, %cst_11 {dimension_numbers = #tpu.dot_dimension_numbers<[1], [0], [0], [1], [0, 0, 1, 1], [], []>} : vector<8x128xbf16>, vector<128x128xbf16>, vector<8x128xf32> -> vector<8x128xf32>
    %16 = arith.addf %13, %15 : vector<8x128xf32>
    %17 = math.tanh %16 : vector<8x128xf32>
    %c1_i32 = arith.constant 1 : i32
    %c8_i32_12 = arith.constant 8 : i32
    %18 = arith.muli %c1_i32, %c8_i32_12 : i32
    %19 = tpu.assume_multiple %18, 8 : i32
    %20 = arith.index_cast %19 : i32 to index
    %c0_13 = arith.constant 0 : index
    %21 = vector.load %arg8[%20, %c0_13] : memref<64x128xf32, #tpu.memory_space<vmem>>, vector<8x128xf32>
    %22 = arith.truncf %17 : vector<8x128xf32> to vector<8x128xbf16>
    %cst_14 = arith.constant dense<0.000000e+00> : vector<8x128xf32>
    %23 = tpu.matmul %22, %8, %cst_14 {dimension_numbers = #tpu.dot_dimension_numbers<[1], [0], [0], [1], [0, 0, 1, 1], [], []>} : vector<8x128xbf16>, vector<128x128xbf16>, vector<8x128xf32> -> vector<8x128xf32>
    %24 = arith.addf %21, %23 : vector<8x128xf32>
    %25 = math.tanh %24 : vector<8x128xf32>
    %c2_i32 = arith.constant 2 : i32
    %c8_i32_15 = arith.constant 8 : i32
    %26 = arith.muli %c2_i32, %c8_i32_15 : i32
    %27 = tpu.assume_multiple %26, 8 : i32
    %28 = arith.index_cast %27 : i32 to index
    %c0_16 = arith.constant 0 : index
    %29 = vector.load %arg8[%28, %c0_16] : memref<64x128xf32, #tpu.memory_space<vmem>>, vector<8x128xf32>
    %30 = arith.truncf %25 : vector<8x128xf32> to vector<8x128xbf16>
    %cst_17 = arith.constant dense<0.000000e+00> : vector<8x128xf32>
    %31 = tpu.matmul %30, %8, %cst_17 {dimension_numbers = #tpu.dot_dimension_numbers<[1], [0], [0], [1], [0, 0, 1, 1], [], []>} : vector<8x128xbf16>, vector<128x128xbf16>, vector<8x128xf32> -> vector<8x128xf32>
    %32 = arith.addf %29, %31 : vector<8x128xf32>
    %33 = math.tanh %32 : vector<8x128xf32>
    %c3_i32 = arith.constant 3 : i32
    %c8_i32_18 = arith.constant 8 : i32
    %34 = arith.muli %c3_i32, %c8_i32_18 : i32
    %35 = tpu.assume_multiple %34, 8 : i32
    %36 = arith.index_cast %35 : i32 to index
    %c0_19 = arith.constant 0 : index
    %37 = vector.load %arg8[%36, %c0_19] : memref<64x128xf32, #tpu.memory_space<vmem>>, vector<8x128xf32>
    %38 = arith.truncf %33 : vector<8x128xf32> to vector<8x128xbf16>
    %cst_20 = arith.constant dense<0.000000e+00> : vector<8x128xf32>
    %39 = tpu.matmul %38, %8, %cst_20 {dimension_numbers = #tpu.dot_dimension_numbers<[1], [0], [0], [1], [0, 0, 1, 1], [], []>} : vector<8x128xbf16>, vector<128x128xbf16>, vector<8x128xf32> -> vector<8x128xf32>
    %40 = arith.addf %37, %39 : vector<8x128xf32>
    %41 = math.tanh %40 : vector<8x128xf32>
    %c4_i32 = arith.constant 4 : i32
    %c8_i32_21 = arith.constant 8 : i32
    %42 = arith.muli %c4_i32, %c8_i32_21 : i32
    %43 = tpu.assume_multiple %42, 8 : i32
    %44 = arith.index_cast %43 : i32 to index
    %c0_22 = arith.constant 0 : index
    %45 = vector.load %arg8[%44, %c0_22] : memref<64x128xf32, #tpu.memory_space<vmem>>, vector<8x128xf32>
    %46 = arith.truncf %41 : vector<8x128xf32> to vector<8x128xbf16>
    %cst_23 = arith.constant dense<0.000000e+00> : vector<8x128xf32>
    %47 = tpu.matmul %46, %8, %cst_23 {dimension_numbers = #tpu.dot_dimension_numbers<[1], [0], [0], [1], [0, 0, 1, 1], [], []>} : vector<8x128xbf16>, vector<128x128xbf16>, vector<8x128xf32> -> vector<8x128xf32>
    %48 = arith.addf %45, %47 : vector<8x128xf32>
    %49 = math.tanh %48 : vector<8x128xf32>
    %c5_i32 = arith.constant 5 : i32
    %c8_i32_24 = arith.constant 8 : i32
    %50 = arith.muli %c5_i32, %c8_i32_24 : i32
    %51 = tpu.assume_multiple %50, 8 : i32
    %52 = arith.index_cast %51 : i32 to index
    %c0_25 = arith.constant 0 : index
    %53 = vector.load %arg8[%52, %c0_25] : memref<64x128xf32, #tpu.memory_space<vmem>>, vector<8x128xf32>
    %54 = arith.truncf %49 : vector<8x128xf32> to vector<8x128xbf16>
    %cst_26 = arith.constant dense<0.000000e+00> : vector<8x128xf32>
    %55 = tpu.matmul %54, %8, %cst_26 {dimension_numbers = #tpu.dot_dimension_numbers<[1], [0], [0], [1], [0, 0, 1, 1], [], []>} : vector<8x128xbf16>, vector<128x128xbf16>, vector<8x128xf32> -> vector<8x128xf32>
    %56 = arith.addf %53, %55 : vector<8x128xf32>
    %57 = math.tanh %56 : vector<8x128xf32>
    %c6_i32 = arith.constant 6 : i32
    %c8_i32_27 = arith.constant 8 : i32
    %58 = arith.muli %c6_i32, %c8_i32_27 : i32
    %59 = tpu.assume_multiple %58, 8 : i32
    %60 = arith.index_cast %59 : i32 to index
    %c0_28 = arith.constant 0 : index
    %61 = vector.load %arg8[%60, %c0_28] : memref<64x128xf32, #tpu.memory_space<vmem>>, vector<8x128xf32>
    %62 = arith.truncf %57 : vector<8x128xf32> to vector<8x128xbf16>
    %cst_29 = arith.constant dense<0.000000e+00> : vector<8x128xf32>
    %63 = tpu.matmul %62, %8, %cst_29 {dimension_numbers = #tpu.dot_dimension_numbers<[1], [0], [0], [1], [0, 0, 1, 1], [], []>} : vector<8x128xbf16>, vector<128x128xbf16>, vector<8x128xf32> -> vector<8x128xf32>
    %64 = arith.addf %61, %63 : vector<8x128xf32>
    %65 = math.tanh %64 : vector<8x128xf32>
    %c7_i32 = arith.constant 7 : i32
    %c8_i32_30 = arith.constant 8 : i32
    %66 = arith.muli %c7_i32, %c8_i32_30 : i32
    %67 = tpu.assume_multiple %66, 8 : i32
    %68 = arith.index_cast %67 : i32 to index
    %c0_31 = arith.constant 0 : index
    %69 = vector.load %arg8[%68, %c0_31] : memref<64x128xf32, #tpu.memory_space<vmem>>, vector<8x128xf32>
    %70 = arith.truncf %65 : vector<8x128xf32> to vector<8x128xbf16>
    %cst_32 = arith.constant dense<0.000000e+00> : vector<8x128xf32>
    %71 = tpu.matmul %70, %8, %cst_32 {dimension_numbers = #tpu.dot_dimension_numbers<[1], [0], [0], [1], [0, 0, 1, 1], [], []>} : vector<8x128xbf16>, vector<128x128xbf16>, vector<8x128xf32> -> vector<8x128xf32>
    %72 = arith.addf %69, %71 : vector<8x128xf32>
    %73 = math.tanh %72 : vector<8x128xf32>
    %c8_i32_33 = arith.constant 8 : i32
    %c0_34 = arith.constant 0 : index
    %c0_35 = arith.constant 0 : index
    %74 = vector.load %arg7[%c0_34, %c0_35] : memref<8x128xf32, #tpu.memory_space<vmem>>, vector<8x128xf32>
    tpu.vector_store %arg7[%c0_34, %c0_35], %73 {strides = array<i32>} : memref<8x128xf32, #tpu.memory_space<vmem>>, vector<8x128xf32>,
    %75 = arith.truncf %73 : vector<8x128xf32> to vector<8x128xbf16>
    %c0_36 = arith.constant 0 : index
    %c0_37 = arith.constant 0 : index
    %76 = vector.load %arg4[%c0_36, %c0_37] : memref<128x128xbf16, #tpu.memory_space<vmem>>, vector<128x128xbf16>
    %cst_38 = arith.constant dense<0.000000e+00> : vector<8x128xf32>
    %77 = tpu.matmul %75, %76, %cst_38 {dimension_numbers = #tpu.dot_dimension_numbers<[1], [0], [0], [1], [0, 0, 1, 1], [], []>} : vector<8x128xbf16>, vector<128x128xbf16>, vector<8x128xf32> -> vector<8x128xf32>
    %c0_39 = arith.constant 0 : index
    %c0_40 = arith.constant 0 : index
    %78 = vector.load %arg5[%c0_39, %c0_40] : memref<1x128xf32, #tpu.memory_space<vmem>>, vector<1x128xf32>
    %79 = vector.shape_cast %78 : vector<1x128xf32> to vector<1x128xf32>
    %80 = vector.broadcast %79 : vector<1x128xf32> to vector<8x128xf32>
    %81 = arith.addf %77, %80 : vector<8x128xf32>
    %c0_41 = arith.constant 0 : index
    %c0_42 = arith.constant 0 : index
    %82 = vector.load %arg6[%c0_41, %c0_42] : memref<8x128xf32, #tpu.memory_space<vmem>>, vector<8x128xf32>
    tpu.vector_store %arg6[%c0_41, %c0_42], %81 {strides = array<i32>} : memref<8x128xf32, #tpu.memory_space<vmem>>, vector<8x128xf32>,
    return
  }
}

</mosaic_0001>

<bundles_post_ra>
// kernel: tpu_custom_call.1
= control target key start
LH: loop header
LB: loop body
LE: loop exit
PB: predicated region body
PF: predicated region fallthrough
CT: control target
= control target key end

     0   :  { %13 = vsyncpa [#allocation4], 0  ;;  %s1617_s0 = inlined_call_operand.hbm [shape: bf16[64,128], index: 0, kind: input, shape index: {}]   ;;  %s1618_s1 = inlined_call_operand.hbm [shape: bf16[128,128], index: 1, kind: input, shape index: {}]   ;;  %s1619_s2 = inlined_call_operand.hbm [shape: bf16[128,128], index: 2, kind: input, shape index: {}]   ;;  %s1620_s3 = inlined_call_operand.vmem [shape: f32[1,128], index: 3, kind: input, shape index: {}]   ;;  %s1621_s4 = inlined_call_operand.hbm [shape: bf16[128,128], index: 4, kind: input, shape index: {}]   ;;  %s1622_s5 = inlined_call_operand.vmem [shape: f32[1,128], index: 5, kind: input, shape index: {}]   ;;  %s1623_s6 = inlined_call_operand.hbm [shape: f32[8,128], index: 6, kind: output, shape index: {0}]   ;;  %s1624_s7 = inlined_call_operand.hbm [shape: f32[8,128], index: 7, kind: output, shape index: {1}]  }
   0x1   :  { %14 = vsyncpa [#allocation7], 0 }
   0x2   :  { %15 = vsyncpa [#allocation10], 0 }
   0x3   :  { %16 = vsyncpa [#allocation5], 0 }
   0x4   :  { %17 = vsyncpa [#allocation13], 0  ;;  %s1338_s24 = smov [#allocation6]   ;;  %s1339_s26 = smov [#allocation3]  }
   0x5   :  { %s35_s25 = sshll.u32 %s1338_s24, 4  ;;  %s23_s27 = sshll.u32 %s1339_s26, 4  ;;  %s36_s25 = int_to_ptr.vmem [resolvable:$true] %s35_s25  ;;  %s24_s27 = int_to_ptr.vmem [resolvable:$true] %s23_s27 }
   0x6   :  { %s1216_s28 = scalar_lea.vmem %s36_s25, 1024  ;;  %p1221_p1 = scmp.lt.s32.totalorder %s36_s25, %s36_s25 }
   0x7   :  { %p1217_p0 = scmp.ne.s32.totalorder %s36_s25, %s1216_s28  ;;  %p1222_p2 = scmp.lt.s32.totalorder %s1216_s28, %s1216_s28 }
   0x9   :  { %p1223_p3 = por %p1222_p2, %p1221_p1 }
   0xb   :  { %p1224_p4 = pnand %p1223_p3, %p1217_p0 }
   0xd   :  { %1227 = shalt.err (!%p1224_p4)
}
   0xe   :  { %s1340_s29 = smov 64   ;;  %s1341_s30 = smov 4  }
   0xf   :  { %41 = dma.hbm_to_vmem [thread:$0]  %s1618_s1, 1024, %s36_s25, [#allocation7], %s1340_s29, %s1340_s29, %s1341_s30  }
  0x10   :  { %s1236_s10 = scalar_lea.vmem %s24_s27, 512  ;;  %p1241_p6 = scmp.lt.s32.totalorder %s24_s27, %s24_s27 }
  0x11   :  { %p1237_p5 = scmp.ne.s32.totalorder %s24_s27, %s1236_s10  ;;  %p1242_p7 = scmp.lt.s32.totalorder %s1236_s10, %s1236_s10 }
  0x13   :  { %p1243_p8 = por %p1242_p7, %p1241_p6 }
  0x15   :  { %p1244_p9 = pnand %p1243_p8, %p1237_p5 }
  0x17   :  { %1247 = shalt.err (!%p1244_p9)
}
  0x18   :  { %29 = dma.hbm_to_vmem [thread:$0]  %s1617_s0, 512, %s24_s27, [#allocation4], %s1340_s29, %s1340_s29, %s1341_s30  }
  0x19   :  { %s1342_s13 = smov [#allocation8]   ;;  %s1343_s15 = smov [#allocation9]  }
  0x1a   :  { %s47_s14 = sshll.u32 %s1342_s13, 4  ;;  %s61_s16 = sshll.u32 %s1343_s15, 4  ;;  %s48_s14 = int_to_ptr.vmem [resolvable:$true] %s47_s14  ;;  %s62_s16 = int_to_ptr.vmem [resolvable:$true] %s61_s16 }
  0x1b   :  { %s1256_s1 = scalar_lea.vmem %s48_s14, 1024  ;;  %p1261_p11 = scmp.lt.s32.totalorder %s48_s14, %s48_s14 }
  0x1c   :  { %p1257_p10 = scmp.ne.s32.totalorder %s48_s14, %s1256_s1  ;;  %p1262_p12 = scmp.lt.s32.totalorder %s1256_s1, %s1256_s1 }
  0x1e   :  { %p1263_p13 = por %p1262_p12, %p1261_p11 }
  0x20   :  { %p1264_p0 = pnand %p1263_p13, %p1257_p10 }
  0x22   :  { %1267 = shalt.err (!%p1264_p0)
}
  0x23   :  { %53 = dma.hbm_to_vmem [thread:$0]  %s1619_s2, 1024, %s48_s14, [#allocation7], %s1340_s29, %s1340_s29, %s1341_s30  }
  0x24   :  { %s1276_s0 = scalar_lea.vmem %s62_s16, 1024  ;;  %p1281_p2 = scmp.lt.s32.totalorder %s62_s16, %s62_s16 }
  0x25   :  { %p1277_p1 = scmp.ne.s32.totalorder %s62_s16, %s1276_s0  ;;  %p1282_p3 = scmp.lt.s32.totalorder %s1276_s0, %s1276_s0 }
  0x27   :  { %p1283_p4 = por %p1282_p3, %p1281_p2 }
  0x29   :  { %p1284_p5 = pnand %p1283_p4, %p1277_p1 }
  0x2b   :  { %1287 = shalt.err (!%p1284_p5)
}
  0x2c   :  { %67 = dma.hbm_to_vmem [thread:$0]  %s1621_s4, 1024, %s62_s16, [#allocation10], %s1340_s29, %s1340_s29, %s1341_s30  }
  0x2d   :  { %1328 = dma.done.wait [#allocation4], 512  }
  0x2e   :  { %1329 = vsyncadd [#allocation4], 4294966784 }
  0x2f   :  { %1330 = dma.done.wait [#allocation7], 2048  }
  0x30   :  { %1331 = vsyncadd [#allocation7], 4294965248 }
  0x31   :  { %1332 = dma.done.wait [#allocation10], 1024  }
  0x32   :  { %1333 = vsyncadd [#allocation10], 4294966272  ;;  %v1344_v0 = vmov 0.0   ;;  %vm1345_vm0 = vmmov 0   ;;  %v1164_v1 = vld [vmem:[#allocation6 + $0x38] sm:$0xff]   ;;  %v1166_v3 = vld [vmem:[#allocation6 + $0x30] sm:$0xff]  }
  0x33   :  { %973 = vmatprep.subr.bf16.mxu1 %v1344_v0  ;;  %989 = vmatprep.mubr.msk.bf16.mxu1 %vm1345_vm0, %v1344_v0  ;;  %v1416_v2 = vld [vmem:[#allocation8 + $0x38] sm:$0xff]   ;;  %v1419_v4 = vld [vmem:[#allocation8 + $0x30] sm:$0xff]   ;;  %v1168_v5 = vld [vmem:[#allocation6 + $0x28] sm:$0xff]   ;;  %v1346_v19 = vmov 0  }
  0x34   :  { %949 = vmatprep.subr.bf16.mxu0 %v1164_v1  ;;  %974 = vmatpush3.bf16.msra.mxu1 %v1416_v2  ;;  %v1423_v6 = vld [vmem:[#allocation8 + $0x28] sm:$0xff]   ;;  %v1170_v7 = vld [vmem:[#allocation6 + $0x20] sm:$0xff]   ;;  %v1172_v9 = vld [vmem:[#allocation6 + $0x18] sm:$0xff]  }
  0x35   :  { %950 = vmatpush3.bf16.msra.mxu0 %v1164_v1  ;;  %975 = vmatprep.subr.bf16.mxu1 %v1344_v0  ;;  %v1427_v8 = vld [vmem:[#allocation8 + $0x20] sm:$0xff]   ;;  %v1430_v10 = vld [vmem:[#allocation8 + $0x18] sm:$0xff]   ;;  %v1174_v11 = vld [vmem:[#allocation6 + $0x10] sm:$0xff]  }
  0x36   :  { %951 = vmatprep.subr.bf16.mxu0 %v1166_v3  ;;  %v1180_v12 = vld [vmem:[#allocation3] sm:$0xff]   ;;  %v1434_v13 = vld [vmem:[#allocation8 + $0x10] sm:$0xff]   ;;  %v1176_v14 = vld [vmem:[#allocation6 + $0x8] sm:$0xff]  }
  0x37   :  { %965 = vmatprep.mubr.bf16.mxu0 %v1180_v12  ;;  %v1438_v15 = vld [vmem:[#allocation8 + $0x8] sm:$0xff]   ;;  %v1178_v16 = vld [vmem:[#allocation6] sm:$0xff]   ;;  %v1182_v20 = vld [vmem:[#allocation3 + $0x10] sm:$0xff]  }
  0x38   :  { %976 = vmatpush3.bf16.msra.mxu1 %v1419_v4  ;;  %v1443_v17 = vld [vmem:[#allocation8] sm:$0xff]   ;;  %v1181_v18 = vld [vmem:[#allocation3 + $0x8] sm:$0xff]   ;;  %v1183_v21 = vld [vmem:[#allocation3 + $0x18] sm:$0xff]  }
  0x39   :  { %952 = vmatpush3.bf16.msra.mxu0 %v1166_v3  ;;  %977 = vmatprep.subr.bf16.mxu1 %v1344_v0  ;;  %v1488_v24 = vld [vmem:[%s1620_s3] ss:$0 sm:$0xff]  ;;  %s1347_s3 = smov [#allocation12]  }
  0x3a   :  { %953 = vmatprep.subr.bf16.mxu0 %v1168_v5  ;;  %s811_s21 = sshll.u32 %s1347_s3, 4  ;;  %s812_s21 = int_to_ptr.vmem [resolvable:$true] %s811_s21 }
  0x3b   :  { %s1288_s22 = scalar_lea.vmem %s812_s21, 128  ;;  %p1293_p7 = scmp.lt.s32.totalorder %s812_s21, %s812_s21 }
  0x3c   :  { %978 = vmatpush3.bf16.msra.mxu1 %v1423_v6  ;;  %p1289_p6 = scmp.ne.s32.totalorder %s812_s21, %s1288_s22  ;;  %p1294_p8 = scmp.lt.s32.totalorder %s1288_s22, %s1288_s22 }
  0x3d   :  { %954 = vmatpush3.bf16.msra.mxu0 %v1168_v5  ;;  %979 = vmatprep.subr.bf16.mxu1 %v1344_v0 }
  0x3e   :  { %955 = vmatprep.subr.bf16.mxu0 %v1170_v7  ;;  %p1295_p9 = por %p1294_p8, %p1293_p7 }
  0x40   :  { %980 = vmatpush3.bf16.msra.mxu1 %v1427_v8  ;;  %p1296_p10 = pnand %p1295_p9, %p1289_p6 }
  0x41   :  { %956 = vmatpush3.bf16.msra.mxu0 %v1170_v7  ;;  %981 = vmatprep.subr.bf16.mxu1 %v1344_v0 }
  0x42   :  { %957 = vmatprep.subr.bf16.mxu0 %v1172_v9 }
  0x44   :  { %982 = vmatpush3.bf16.msra.mxu1 %v1430_v10 }
  0x45   :  { %958 = vmatpush3.bf16.msra.mxu0 %v1172_v9  ;;  %983 = vmatprep.subr.bf16.mxu1 %v1344_v0 }
  0x46   :  { %959 = vmatprep.subr.bf16.mxu0 %v1174_v11 }
  0x48   :  { %984 = vmatpush3.bf16.msra.mxu1 %v1434_v13 }
  0x49   :  { %960 = vmatpush3.bf16.msra.mxu0 %v1174_v11  ;;  %985 = vmatprep.subr.bf16.mxu1 %v1344_v0 }
  0x4a   :  { %961 = vmatprep.subr.bf16.mxu0 %v1176_v14 }
  0x4c   :  { %986 = vmatpush3.bf16.msra.mxu1 %v1438_v15 }
  0x4d   :  { %962 = vmatpush3.bf16.msra.mxu0 %v1176_v14  ;;  %987 = vmatprep.subr.bf16.mxu1 %v1344_v0 }
  0x4e   :  { %963 = vmatprep.subr.bf16.mxu0 %v1178_v16 }
  0x50   :  { %988 = vmatpush3.bf16.msra.mxu1 %v1443_v17 }
  0x51   :  { %964 = vmatpush3.bf16.msra.mxu0 %v1178_v16  ;;  %1013 = vmatprep.subr.bf16.mxu1 %v1344_v0 }
  0x52   :  { %993 = vmatprep.subr.bf16.mxu0 %v1344_v0 }
  0x53   :  { %990 = vmatmul.mubr.bf16.vlgmr.msra.gmra.mxu1 %v1346_v19 }
  0x54   :  { %966 = vmatmul.mubr.bf16.vlgmr.msra.gmra.mxu0 %v1181_v18  ;;  %1014 = vmatpush3.bf16.msra.mxu1 %v1416_v2 }
  0x55   :  { %994 = vmatpush3.bf16.msra.mxu0 %v1416_v2  ;;  %1015 = vmatprep.subr.bf16.mxu1 %v1344_v0 }
  0x56   :  { %995 = vmatprep.subr.bf16.mxu0 %v1344_v0  ;;  %1029 = vmatprep.mubr.msk.bf16.mxu1 %vm1345_vm0, %v1344_v0 }
  0x57   :  { %969 = vmatprep.mubr.bf16.mxu0 %v1182_v20 }
  0x58   :  { %1016 = vmatpush3.bf16.msra.mxu1 %v1419_v4 }
  0x59   :  { %996 = vmatpush3.bf16.msra.mxu0 %v1419_v4  ;;  %1017 = vmatprep.subr.bf16.mxu1 %v1344_v0 }
  0x5a   :  { %997 = vmatprep.subr.bf16.mxu0 %v1344_v0 }
  0x5c   :  { %1018 = vmatpush3.bf16.msra.mxu1 %v1423_v6  ;;  %970 = vmatmul.mubr.bf16.gmra.mxu0 %v1183_v21 }
  0x5d   :  { %998 = vmatpush3.bf16.msra.mxu0 %v1423_v6  ;;  %1019 = vmatprep.subr.bf16.mxu1 %v1344_v0 }
  0x5e   :  { %999 = vmatprep.subr.bf16.mxu0 %v1344_v0  ;;  %1009 = vmatprep.mubr.msk.bf16.mxu0 %vm1345_vm0, %v1344_v0 }
  0x60   :  { %1020 = vmatpush3.bf16.msra.mxu1 %v1427_v8 }
  0x61   :  { %1000 = vmatpush3.bf16.msra.mxu0 %v1427_v8  ;;  %1021 = vmatprep.subr.bf16.mxu1 %v1344_v0 }
  0x62   :  { %1001 = vmatprep.subr.bf16.mxu0 %v1344_v0 }
  0x64   :  { %1022 = vmatpush3.bf16.msra.mxu1 %v1430_v10 }
  0x65   :  { %1002 = vmatpush3.bf16.msra.mxu0 %v1430_v10  ;;  %1023 = vmatprep.subr.bf16.mxu1 %v1344_v0 }
  0x66   :  { %1003 = vmatprep.subr.bf16.mxu0 %v1344_v0 }
  0x68   :  { %1024 = vmatpush3.bf16.msra.mxu1 %v1434_v13 }
  0x69   :  { %1004 = vmatpush3.bf16.msra.mxu0 %v1434_v13  ;;  %1025 = vmatprep.subr.bf16.mxu1 %v1344_v0 }
  0x6a   :  { %1005 = vmatprep.subr.bf16.mxu0 %v1344_v0 }
  0x6c   :  { %1026 = vmatpush3.bf16.msra.mxu1 %v1438_v15 }
  0x6d   :  { %1006 = vmatpush3.bf16.msra.mxu0 %v1438_v15  ;;  %1027 = vmatprep.subr.bf16.mxu1 %v1344_v0 }
  0x6e   :  { %1007 = vmatprep.subr.bf16.mxu0 %v1344_v0 }
  0x70   :  { %1028 = vmatpush3.bf16.msra.mxu1 %v1443_v17 }
  0x71   :  { %1008 = vmatpush3.bf16.msra.mxu0 %v1443_v17  ;;  %1053 = vmatprep.subr.bf16.mxu1 %v1344_v0 }
  0x72   :  { %1033 = vmatprep.subr.bf16.mxu0 %v1344_v0 }
 0x113   :  { %v358_v22 = vpop.f32.mrf.mxu1 }
 0x114   :  { %v967_v23 = vpop.f32.mrf.mxu0 }
 0x115   :  { %v991_v25 = vpop.f32.mrf.mxu1  ;;  %v229_v47 = vadd.f32 %v967_v23, %v1488_v24 }
 0x116   :  { %v220_v26 = vpop.f32.mrf.mxu0 }
 0x117   :  { %v221_v27 = vadd.f32 %v1488_v24, %v220_v26  ;;  %v361_v28 = vpop.f32.mrf.mxu1 }
 0x118   :  { %v968_v33 = vpop.f32.mrf.mxu0  ;;  %v1187_v28 = vld [vmem:[#allocation9 + $0x20] sm:$0xff]  }
 0x119   :  { %v364_v29 = vadd.f32 %v358_v22, %v221_v27  ;;  %v992_v30 = vpop.f32.mrf.mxu1  ;;  %v232_v55 = vadd.f32 %v968_v33, %v1488_v24 }
 0x11a   :  { %v223_v34 = vpop.f32.mrf.mxu0  ;;  %v1189_v30 = vld [vmem:[#allocation9 + $0x10] sm:$0xff]  }
 0x11b   :  { %1192 = vtanh.f32 %v364_v29  ;;  %v224_v39 = vadd.f32 %v1488_v24, %v223_v34  ;;  %v1188_v29 = vld [vmem:[#allocation9 + $0x18] sm:$0xff]  }
 0x11c   :  { %v1509_v35 = vpop.f32.mrf.mxu0 }
 0x11d   :  { %v245_v19 = vadd.f32 %v1509_v35, %v1488_v24 }
 0x11e   :  { %v1511_v36 = vpop.f32.mrf.mxu0 }
 0x11f   :  { %v237_v63 = vadd.f32 %v1488_v24, %v1511_v36 }
 0x120   :  { %v1513_v37 = vpop.f32.mrf.mxu0 }
 0x121   :  { %v248_v33 = vadd.f32 %v1513_v37, %v1488_v24 }
 0x122   :  { %v1515_v38 = vpop.f32.mrf.mxu0 }
 0x128   :  { %v1193_v31 = vpop.eup %1192 }
 0x129   :  { %v368_v32 = vpack.c.bf16 %v1193_v31, %v1193_v31  ;;  %v1190_v31 = vld [vmem:[#allocation9 + $0x8] sm:$0xff]  }
 0x12b   :  { %1010 = vmatmul.mubr.bf16.vlgmr.msra.gmra.mxu0 %v368_v32  ;;  %v1191_v32 = vld [vmem:[#allocation9] sm:$0xff]  }
 0x12c   :  { %1034 = vmatpush3.bf16.msra.mxu0 %v1416_v2  ;;  %1049 = vmatprep.mubr.msk.bf16.mxu0 %vm1345_vm0, %v1344_v0 }
 0x12d   :  { %1035 = vmatprep.subr.bf16.mxu0 %v1344_v0 }
 0x130   :  { %1036 = vmatpush3.bf16.msra.mxu0 %v1419_v4 }
 0x131   :  { %1037 = vmatprep.subr.bf16.mxu0 %v1344_v0 }
 0x134   :  { %1038 = vmatpush3.bf16.msra.mxu0 %v1423_v6 }
 0x135   :  { %1039 = vmatprep.subr.bf16.mxu0 %v1344_v0 }
 0x138   :  { %1040 = vmatpush3.bf16.msra.mxu0 %v1427_v8 }
 0x139   :  { %1041 = vmatprep.subr.bf16.mxu0 %v1344_v0 }
 0x13c   :  { %1042 = vmatpush3.bf16.msra.mxu0 %v1430_v10 }
 0x13d   :  { %1043 = vmatprep.subr.bf16.mxu0 %v1344_v0 }
 0x140   :  { %1044 = vmatpush3.bf16.msra.mxu0 %v1434_v13 }
 0x141   :  { %1045 = vmatprep.subr.bf16.mxu0 %v1344_v0 }
 0x144   :  { %1046 = vmatpush3.bf16.msra.mxu0 %v1438_v15 }
 0x145   :  { %1047 = vmatprep.subr.bf16.mxu0 %v1344_v0 }
 0x148   :  { %1048 = vmatpush3.bf16.msra.mxu0 %v1443_v17 }
 0x149   :  { %1073 = vmatprep.subr.bf16.mxu0 %v1344_v0 }
 0x1eb   :  { %v403_v40 = vpop.f32.mrf.mxu0 }
 0x1ec   :  { %v409_v41 = vadd.f32 %v403_v40, %v224_v39 }
 0x1ed   :  { %v1011_v42 = vpop.f32.mrf.mxu0 }
 0x1ee   :  { %1194 = vtanh.f32 %v409_v41 }
 0x1ef   :  { %v406_v43 = vpop.f32.mrf.mxu0 }
 0x1f1   :  { %v1012_v44 = vpop.f32.mrf.mxu0 }
 0x1fb   :  { %v1195_v45 = vpop.eup %1194 }
 0x1fc   :  { %v413_v46 = vpack.c.bf16 %v1195_v45, %v1195_v45 }
 0x1fe   :  { %1030 = vmatmul.mubr.bf16.vlgmr.msra.gmra.mxu1 %v413_v46 }
 0x1ff   :  { %1054 = vmatpush3.bf16.msra.mxu1 %v1416_v2  ;;  %1069 = vmatprep.mubr.msk.bf16.mxu1 %vm1345_vm0, %v1344_v0 }
 0x200   :  { %1055 = vmatprep.subr.bf16.mxu1 %v1344_v0 }
 0x203   :  { %1056 = vmatpush3.bf16.msra.mxu1 %v1419_v4 }
 0x204   :  { %1057 = vmatprep.subr.bf16.mxu1 %v1344_v0 }
 0x207   :  { %1058 = vmatpush3.bf16.msra.mxu1 %v1423_v6 }
 0x208   :  { %1059 = vmatprep.subr.bf16.mxu1 %v1344_v0 }
 0x20b   :  { %1060 = vmatpush3.bf16.msra.mxu1 %v1427_v8 }
 0x20c   :  { %1061 = vmatprep.subr.bf16.mxu1 %v1344_v0 }
 0x20f   :  { %1062 = vmatpush3.bf16.msra.mxu1 %v1430_v10 }
 0x210   :  { %1063 = vmatprep.subr.bf16.mxu1 %v1344_v0 }
 0x213   :  { %1064 = vmatpush3.bf16.msra.mxu1 %v1434_v13 }
 0x214   :  { %1065 = vmatprep.subr.bf16.mxu1 %v1344_v0 }
 0x217   :  { %1066 = vmatpush3.bf16.msra.mxu1 %v1438_v15 }
 0x218   :  { %1067 = vmatprep.subr.bf16.mxu1 %v1344_v0 }
 0x21b   :  { %1068 = vmatpush3.bf16.msra.mxu1 %v1443_v17 }
 0x21c   :  { %1093 = vmatprep.subr.bf16.mxu1 %v1344_v0 }
 0x2be   :  { %v448_v48 = vpop.f32.mrf.mxu1 }
 0x2bf   :  { %v454_v49 = vadd.f32 %v448_v48, %v229_v47 }
 0x2c0   :  { %v1031_v50 = vpop.f32.mrf.mxu1 }
 0x2c1   :  { %1196 = vtanh.f32 %v454_v49 }
 0x2c2   :  { %v451_v51 = vpop.f32.mrf.mxu1 }
 0x2c4   :  { %v1032_v52 = vpop.f32.mrf.mxu1 }
 0x2ce   :  { %v1197_v53 = vpop.eup %1196 }
 0x2cf   :  { %v458_v54 = vpack.c.bf16 %v1197_v53, %v1197_v53 }
 0x2d1   :  { %1050 = vmatmul.mubr.bf16.vlgmr.msra.gmra.mxu0 %v458_v54 }
 0x2d2   :  { %1074 = vmatpush3.bf16.msra.mxu0 %v1416_v2  ;;  %1089 = vmatprep.mubr.msk.bf16.mxu0 %vm1345_vm0, %v1344_v0 }
 0x2d3   :  { %1075 = vmatprep.subr.bf16.mxu0 %v1344_v0 }
 0x2d6   :  { %1076 = vmatpush3.bf16.msra.mxu0 %v1419_v4 }
 0x2d7   :  { %1077 = vmatprep.subr.bf16.mxu0 %v1344_v0 }
 0x2da   :  { %1078 = vmatpush3.bf16.msra.mxu0 %v1423_v6 }
 0x2db   :  { %1079 = vmatprep.subr.bf16.mxu0 %v1344_v0 }
 0x2de   :  { %1080 = vmatpush3.bf16.msra.mxu0 %v1427_v8 }
 0x2df   :  { %1081 = vmatprep.subr.bf16.mxu0 %v1344_v0 }
 0x2e2   :  { %1082 = vmatpush3.bf16.msra.mxu0 %v1430_v10 }
 0x2e3   :  { %1083 = vmatprep.subr.bf16.mxu0 %v1344_v0 }
 0x2e6   :  { %1084 = vmatpush3.bf16.msra.mxu0 %v1434_v13 }
 0x2e7   :  { %1085 = vmatprep.subr.bf16.mxu0 %v1344_v0 }
 0x2ea   :  { %1086 = vmatpush3.bf16.msra.mxu0 %v1438_v15 }
 0x2eb   :  { %1087 = vmatprep.subr.bf16.mxu0 %v1344_v0 }
 0x2ee   :  { %1088 = vmatpush3.bf16.msra.mxu0 %v1443_v17 }
 0x2ef   :  { %1113 = vmatprep.subr.bf16.mxu0 %v1344_v0 }
 0x391   :  { %v493_v56 = vpop.f32.mrf.mxu0 }
 0x392   :  { %v499_v57 = vadd.f32 %v493_v56, %v232_v55 }
 0x393   :  { %v1051_v58 = vpop.f32.mrf.mxu0 }
 0x394   :  { %1198 = vtanh.f32 %v499_v57 }
 0x395   :  { %v496_v59 = vpop.f32.mrf.mxu0 }
 0x397   :  { %v1052_v60 = vpop.f32.mrf.mxu0 }
 0x3a1   :  { %v1199_v61 = vpop.eup %1198 }
 0x3a2   :  { %v503_v62 = vpack.c.bf16 %v1199_v61, %v1199_v61 }
 0x3a4   :  { %1070 = vmatmul.mubr.bf16.vlgmr.msra.gmra.mxu1 %v503_v62 }
 0x3a5   :  { %1094 = vmatpush3.bf16.msra.mxu1 %v1416_v2  ;;  %1109 = vmatprep.mubr.msk.bf16.mxu1 %vm1345_vm0, %v1344_v0 }
 0x3a6   :  { %1095 = vmatprep.subr.bf16.mxu1 %v1344_v0 }
 0x3a9   :  { %1096 = vmatpush3.bf16.msra.mxu1 %v1419_v4 }
 0x3aa   :  { %1097 = vmatprep.subr.bf16.mxu1 %v1344_v0 }
 0x3ad   :  { %1098 = vmatpush3.bf16.msra.mxu1 %v1423_v6 }
 0x3ae   :  { %1099 = vmatprep.subr.bf16.mxu1 %v1344_v0 }
 0x3b1   :  { %1100 = vmatpush3.bf16.msra.mxu1 %v1427_v8 }
 0x3b2   :  { %1101 = vmatprep.subr.bf16.mxu1 %v1344_v0 }
 0x3b5   :  { %1102 = vmatpush3.bf16.msra.mxu1 %v1430_v10 }
 0x3b6   :  { %1103 = vmatprep.subr.bf16.mxu1 %v1344_v0 }
 0x3b9   :  { %1104 = vmatpush3.bf16.msra.mxu1 %v1434_v13 }
 0x3ba   :  { %1105 = vmatprep.subr.bf16.mxu1 %v1344_v0 }
 0x3bd   :  { %1106 = vmatpush3.bf16.msra.mxu1 %v1438_v15 }
 0x3be   :  { %1107 = vmatprep.subr.bf16.mxu1 %v1344_v0 }
 0x3c1   :  { %1108 = vmatpush3.bf16.msra.mxu1 %v1443_v17 }
 0x3c2   :  { %1133 = vmatprep.subr.bf16.mxu1 %v1344_v0 }
 0x464   :  { %v538_v1 = vpop.f32.mrf.mxu1 }
 0x465   :  { %v544_v3 = vadd.f32 %v538_v1, %v237_v63 }
 0x466   :  { %v1071_v5 = vpop.f32.mrf.mxu1 }
 0x467   :  { %1200 = vtanh.f32 %v544_v3 }
 0x468   :  { %v541_v7 = vpop.f32.mrf.mxu1 }
 0x46a   :  { %v1072_v9 = vpop.f32.mrf.mxu1 }
 0x474   :  { %v1201_v11 = vpop.eup %1200 }
 0x475   :  { %v548_v12 = vpack.c.bf16 %v1201_v11, %v1201_v11 }
 0x477   :  { %1090 = vmatmul.mubr.bf16.vlgmr.msra.gmra.mxu0 %v548_v12 }
 0x478   :  { %1114 = vmatpush3.bf16.msra.mxu0 %v1416_v2  ;;  %1129 = vmatprep.mubr.msk.bf16.mxu0 %vm1345_vm0, %v1344_v0  ;;  %v240_v2 = vadd.f32 %v1488_v24, %v1515_v38 }
 0x479   :  { %1115 = vmatprep.subr.bf16.mxu0 %v1344_v0 }
 0x47c   :  { %1116 = vmatpush3.bf16.msra.mxu0 %v1419_v4 }
 0x47d   :  { %1117 = vmatprep.subr.bf16.mxu0 %v1344_v0 }
 0x480   :  { %1118 = vmatpush3.bf16.msra.mxu0 %v1423_v6 }
 0x481   :  { %1119 = vmatprep.subr.bf16.mxu0 %v1344_v0 }
 0x484   :  { %1120 = vmatpush3.bf16.msra.mxu0 %v1427_v8 }
 0x485   :  { %1121 = vmatprep.subr.bf16.mxu0 %v1344_v0 }
 0x488   :  { %1122 = vmatpush3.bf16.msra.mxu0 %v1430_v10 }
 0x489   :  { %1123 = vmatprep.subr.bf16.mxu0 %v1344_v0 }
 0x48c   :  { %1124 = vmatpush3.bf16.msra.mxu0 %v1434_v13  ;;  %v1184_v13 = vld [vmem:[#allocation9 + $0x38] sm:$0xff]  }
 0x48d   :  { %1125 = vmatprep.subr.bf16.mxu0 %v1344_v0 }
 0x490   :  { %1126 = vmatpush3.bf16.msra.mxu0 %v1438_v15  ;;  %v1185_v15 = vld [vmem:[#allocation9 + $0x30] sm:$0xff]  }
 0x491   :  { %1127 = vmatprep.subr.bf16.mxu0 %v1344_v0 }
 0x494   :  { %1128 = vmatpush3.bf16.msra.mxu0 %v1443_v17  ;;  %v1186_v17 = vld [vmem:[#allocation9 + $0x28] sm:$0xff]  }
 0x537   :  { %v583_v4 = vpop.f32.mrf.mxu0 }
 0x538   :  { %v589_v6 = vadd.f32 %v583_v4, %v240_v2 }
 0x539   :  { %v1091_v8 = vpop.f32.mrf.mxu0 }
 0x53a   :  { %1202 = vtanh.f32 %v589_v6 }
 0x53b   :  { %v586_v10 = vpop.f32.mrf.mxu0 }
 0x53d   :  { %v1092_v14 = vpop.f32.mrf.mxu0 }
 0x547   :  { %v1203_v16 = vpop.eup %1202 }
 0x548   :  { %v593_v18 = vpack.c.bf16 %v1203_v16, %v1203_v16 }
 0x54a   :  { %1110 = vmatmul.mubr.bf16.vlgmr.msra.gmra.mxu1 %v593_v18 }
 0x54b   :  { %1149 = vmatprep.mubr.msk.bf16.mxu1 %vm1345_vm0, %v1344_v0  ;;  %1134 = vmatpush3.bf16.msra.mxu1 %v1184_v13 }
 0x54c   :  { %1135 = vmatprep.subr.bf16.mxu1 %v1344_v0 }
 0x54f   :  { %1136 = vmatpush3.bf16.msra.mxu1 %v1185_v15 }
 0x550   :  { %1137 = vmatprep.subr.bf16.mxu1 %v1344_v0 }
 0x553   :  { %1138 = vmatpush3.bf16.msra.mxu1 %v1186_v17 }
 0x554   :  { %1139 = vmatprep.subr.bf16.mxu1 %v1344_v0 }
 0x557   :  { %1140 = vmatpush3.bf16.msra.mxu1 %v1187_v28 }
 0x558   :  { %1141 = vmatprep.subr.bf16.mxu1 %v1344_v0 }
 0x55b   :  { %1142 = vmatpush3.bf16.msra.mxu1 %v1188_v29 }
 0x55c   :  { %1143 = vmatprep.subr.bf16.mxu1 %v1344_v0 }
 0x55f   :  { %1144 = vmatpush3.bf16.msra.mxu1 %v1189_v30 }
 0x560   :  { %1145 = vmatprep.subr.bf16.mxu1 %v1344_v0 }
 0x563   :  { %1146 = vmatpush3.bf16.msra.mxu1 %v1190_v31 }
 0x564   :  { %1147 = vmatprep.subr.bf16.mxu1 %v1344_v0 }
 0x567   :  { %1148 = vmatpush3.bf16.msra.mxu1 %v1191_v32 }
 0x60a   :  { %v628_v20 = vpop.f32.mrf.mxu1 }
 0x60b   :  { %v634_v21 = vadd.f32 %v628_v20, %v245_v19 }
 0x60c   :  { %v1111_v22 = vpop.f32.mrf.mxu1 }
 0x60d   :  { %1204 = vtanh.f32 %v634_v21 }
 0x60e   :  { %v631_v23 = vpop.f32.mrf.mxu1 }
 0x610   :  { %v1112_v25 = vpop.f32.mrf.mxu1 }
 0x61a   :  { %v1205_v26 = vpop.eup %1204 }
 0x61b   :  { %v638_v27 = vpack.c.bf16 %v1205_v26, %v1205_v26 }
 0x61d   :  { %1130 = vmatmul.mubr.bf16.vlgmr.msra.gmra.mxu0 %v638_v27 }
 0x6dd   :  { %v673_v34 = vpop.f32.mrf.mxu0 }
 0x6de   :  { %v679_v35 = vadd.f32 %v673_v34, %v248_v33 }
 0x6df   :  { %v1131_v36 = vpop.f32.mrf.mxu0 }
 0x6e0   :  { %1206 = vtanh.f32 %v679_v35 }
 0x6e1   :  { %v676_v38 = vpop.f32.mrf.mxu0 }
 0x6e3   :  { %v1132_v39 = vpop.f32.mrf.mxu0 }
 0x6ed   :  { %v1207_v40 = vpop.eup %1206 }
 0x6ee   :  { %681 = vst [vmem:[#allocation12] sm:$0xff] %v1207_v40  ;;  %v682_v41 = vpack.c.bf16 %v1207_v40, %v1207_v40 }
 0x6f0   :  { %1150 = vmatmul.mubr.bf16.vlgmr.msra.gmra.mxu1 %v682_v41 }
 0x6f1   :  { %1299 = shalt.err (!%p1296_p10)
}
 0x6f2   :  { %814 = dma.vmem_to_hbm [thread:$0]  %s812_s21, 128, %s1624_s7, [#allocation13]   ;;  %v847_v0 = vld [vmem:[%s1622_s5] ss:$0 sm:$0xff] }
 0x6f3   :  { %s1348_s27 = smov [#allocation11]  }
 0x6f4   :  { %s801_s28 = sshll.u32 %s1348_s27, 4  ;;  %s802_s28 = int_to_ptr.vmem [resolvable:$true] %s801_s28 }
 0x6f5   :  { %s1308_s29 = scalar_lea.vmem %s802_s28, 128  ;;  %p1313_p12 = scmp.lt.s32.totalorder %s802_s28, %s802_s28 }
 0x6f6   :  { %p1309_p11 = scmp.ne.s32.totalorder %s802_s28, %s1308_s29  ;;  %p1314_p13 = scmp.lt.s32.totalorder %s1308_s29, %s1308_s29 }
 0x6f8   :  { %p1315_p0 = por %p1314_p13, %p1313_p12 }
 0x6fa   :  { %p1316_p1 = pnand %p1315_p0, %p1309_p11 }
 0x7b0   :  { %v788_v24 = vpop.f32.mrf.mxu1 }
 0x7b1   :  { %v789_v37 = vadd.f32 %v847_v0, %v788_v24 }
 0x7b2   :  { %v1151_v42 = vpop.f32.mrf.mxu1 }
 0x7b3   :  { %794 = vst [vmem:[#allocation11] sm:$0xff] %v789_v37 }
 0x7b4   :  { %v791_v43 = vpop.f32.mrf.mxu1 }
 0x7b5   :  { %1319 = shalt.err (!%p1316_p1)
}
 0x7b6   :  { %804 = dma.vmem_to_hbm [thread:$0]  %s802_s28, 128, %s1623_s6, [#allocation5]   ;;  %v1152_v44 = vpop.f32.mrf.mxu1 }
 0x7b7   :  { %1334 = dma.done.wait [#allocation5], 128  }
 0x7b8   :  { %1335 = vsyncadd [#allocation5], 4294967168 }
 0x7b9   :  { %1336 = dma.done.wait [#allocation13], 128  }
 0x7ba   :  { %1337 = vsyncadd [#allocation13], 4294967168 }
 0x7bb   :  { %821 = vsyncpa [#allocation4], 1 }
 0x7bc   :  { %822 = vsyncpa [#allocation7], 1 }
 0x7bd   :  { %823 = vsyncpa [#allocation10], 1 }
 0x7be   :  { %824 = vsyncpa [#allocation5], 1 }
 0x7bf   :  { %825 = vsyncpa [#allocation13], 1 }

</bundles_post_ra>
